<compile_context>
chip_gen: v7x
topology: tpu7x:2x2x1
jax: 0.10.0
libtpu: 0.0.40
codegen_flags: <defaults>
</compile_context>

<pallas_src>
import functools

import jax
import jax.numpy as jnp
from jax.experimental import pallas as pl
from jax.experimental.pallas import tpu as pltpu

EPS = 1e-5


def _round_up(x, m):
    return (x + m - 1) // m * m


# ----------------------------------------------------------------------------
# Pallas kernel: whole-K GEMM tile with fused affine (BN/bias) + activation
#   out = act((A @ B) * scale + shift)     scale/shift broadcast over rows
# ----------------------------------------------------------------------------
def _gemm_affine_kernel(a_ref, b_ref, scale_ref, shift_ref, o_ref, *,
                        activation):
    acc = jnp.dot(a_ref[...], b_ref[...],
                  preferred_element_type=jnp.float32)
    y = acc * scale_ref[...] + shift_ref[...]
    if activation == "relu":
        y = jnp.maximum(y, 0.0)
    o_ref[...] = y.astype(o_ref.dtype)


def gemm_affine(a, w_bf16, scale, shift, activation="none"):
    """Fused  act((a @ w) * scale + shift).

    a       : [M, K]  float32 (or bf16) activations
    w_bf16  : [K, Np] bfloat16 pre-transposed / pre-padded weight (Np % 128 == 0)
    scale   : [1, Np] float32   (BN scale folded; ones if no BN)
    shift   : [1, Np] float32   (BN shift + bias folded)
    returns : [Mp, Np] float32  (row-padded; caller slices once at the end)
    """
    M, K = a.shape
    Kp, Np = w_bf16.shape
    assert Kp == K, f"K mismatch: activations {K} vs weight {Kp}"
    assert Np % 128 == 0

    # Row (sublane) padding; carried through the net, sliced once at the end.
    Mp = _round_up(max(M, 16), 16)
    tm = min(Mp, 512)
    Mp = _round_up(Mp, tm)

    a_p = a.astype(jnp.bfloat16)
    if Mp != M:
        a_p = jnp.pad(a_p, ((0, Mp - M), (0, 0)))

    # 256-wide N tiles where possible (v6e/v7x 2x256 MXU), else 128.
    tn = 256 if Np % 256 == 0 else 128

    kernel = functools.partial(_gemm_affine_kernel, activation=activation)
    out = pl.pallas_call(
        kernel,
        out_shape=jax.ShapeDtypeStruct((Mp, Np), jnp.float32),
        grid=(Mp // tm, Np // tn),
        in_specs=[
            pl.BlockSpec((tm, Kp), lambda i, j: (i, 0)),   # full-K block
            pl.BlockSpec((Kp, tn), lambda i, j: (0, j)),
            pl.BlockSpec((1, tn), lambda i, j: (0, j)),
            pl.BlockSpec((1, tn), lambda i, j: (0, j)),
        ],
        out_specs=pl.BlockSpec((tm, tn), lambda i, j: (i, j)),
        compiler_params=pltpu.CompilerParams(
            dimension_semantics=("parallel", "parallel")),
        cost_estimate=pl.CostEstimate(
            flops=2 * Mp * Np * Kp,
            transcendentals=0,
            bytes_accessed=Mp * Kp * 2 + Kp * Np * 2 + Mp * Np * 4),
    )(a_p, w_bf16, scale, shift)
    return out


# ----------------------------------------------------------------------------
# One-time parameter preparation (hoisted out of the per-forward path):
# fold eval-mode BN + bias into (scale, shift); transpose/cast/pad weights.
# ----------------------------------------------------------------------------
def prepare_params(raw):
    def prep_layer(lin, bn):
        w = jnp.asarray(lin["w"], jnp.float32)   # [out, in] (PyTorch layout)
        b = jnp.asarray(lin["b"], jnp.float32)
        n = w.shape[0]
        if bn is not None:
            s = bn["gamma"] / jnp.sqrt(bn["var"] + EPS)
            scale = s
            shift = s * (b - bn["mean"]) + bn["beta"]
        else:
            scale = jnp.ones((n,), jnp.float32)
            shift = b
        np_ = _round_up(n, 128)
        w_t = jnp.pad(w.T.astype(jnp.bfloat16), ((0, 0), (0, np_ - n)))
        scale = jnp.pad(scale, (0, np_ - n)).astype(jnp.float32)[None, :]
        shift = jnp.pad(shift, (0, np_ - n)).astype(jnp.float32)[None, :]
        return {"w": w_t, "scale": scale, "shift": shift}

    return {
        "l1": prep_layer(raw["fc1"], raw["bn1"]),
        "l2": prep_layer(raw["fc2"], raw["bn2"]),
        "l3": prep_layer(raw["fc3"], None),
    }


# ----------------------------------------------------------------------------
# Model forward (matches Classifier.forward)
# ----------------------------------------------------------------------------
def classifier_forward(params, x, *, num_classes):
    m = x.shape[0]
    h = gemm_affine(x, params["l1"]["w"], params["l1"]["scale"],
                    params["l1"]["shift"], "relu")
    # TODO(synk): Dropout(0.3) is identity (inference mode).
    h = gemm_affine(h, params["l2"]["w"], params["l2"]["scale"],
                    params["l2"]["shift"], "relu")
    # TODO(synk): Dropout(0.2) is identity (inference mode).
    h = gemm_affine(h, params["l3"]["w"], params["l3"]["scale"],
                    params["l3"]["shift"], "none")
    return h[:m, :num_classes]


# ----------------------------------------------------------------------------
# Deterministic parameter initialization (PyTorch-layout shapes)
# ----------------------------------------------------------------------------
def init_raw_params(key, latent_dim=128, num_classes=10):
    kit = iter(jax.random.split(key, 32))

    def rnd(shape, s=0.05):
        return jax.random.normal(next(kit), shape, jnp.float32) * s

    def lin_p(cout, cin):
        return {"w": rnd((cout, cin)), "b": rnd((cout,))}

    def bn_p(c):
        return {
            "gamma": jax.random.uniform(next(kit), (c,), jnp.float32, 0.8, 1.2),
            "beta": rnd((c,)),
            "mean": rnd((c,)),
            "var": jax.random.uniform(next(kit), (c,), jnp.float32, 0.5, 1.5),
        }

    return {
        "fc1": lin_p(512, latent_dim), "bn1": bn_p(512),
        "fc2": lin_p(256, 512), "bn2": bn_p(256),
        "fc3": lin_p(num_classes, 256),
    }


if __name__ == "__main__":
    latent_dim, num_classes, batch = 128, 10, 4

    key = jax.random.PRNGKey(0)
    pkey, xkey = jax.random.split(key)
    raw = init_raw_params(pkey, latent_dim=latent_dim, num_classes=num_classes)
    params = prepare_params(raw)           # one-time weight/BN prep (not per-call)
    x = jax.random.normal(xkey, (batch, latent_dim), jnp.float32)

    fwd = jax.jit(functools.partial(classifier_forward, num_classes=num_classes))
    y = fwd(params, x)
    jax.block_until_ready(y)

    assert y.shape == (batch, num_classes), y.shape
    assert bool(jnp.all(jnp.isfinite(y)))
    print("KERNEL_OK")
</pallas_src>

<mosaic_0001>
module attributes {stable_mosaic.version = 11 : i64} {
  func.func @_gemm_affine_kernel(%arg0: i32, %arg1: i32, %arg2: memref<16x128xbf16, #tpu.memory_space<vmem>>, %arg3: memref<128x256xbf16, #tpu.memory_space<vmem>>, %arg4: memref<1x256xf32, #tpu.memory_space<vmem>>, %arg5: memref<1x256xf32, #tpu.memory_space<vmem>>, %arg6: memref<16x256xf32, #tpu.memory_space<vmem>>) attributes {dimension_semantics = [#tpu.dimension_semantics<parallel>, #tpu.dimension_semantics<parallel>], iteration_bounds = array<i64: 1, 2>, scalar_prefetch = 0 : i64, scratch_operands = 0 : i64, tpu.core_type = #tpu.core_type<tc>, window_params = [{transform_indices = @transform_0, window_bounds = array<i64: 16, 128>}, {transform_indices = @transform_1, window_bounds = array<i64: 128, 256>}, {transform_indices = @transform_2, window_bounds = array<i64: 1, 256>}, {transform_indices = @transform_3, window_bounds = array<i64: 1, 256>}, {transform_indices = @transform_4, window_bounds = array<i64: 16, 256>}]} {
    %c0 = arith.constant 0 : index
    %c0_0 = arith.constant 0 : index
    %0 = vector.load %arg2[%c0, %c0_0] : memref<16x128xbf16, #tpu.memory_space<vmem>>, vector<16x128xbf16>
    %c0_1 = arith.constant 0 : index
    %c0_2 = arith.constant 0 : index
    %1 = vector.load %arg3[%c0_1, %c0_2] : memref<128x256xbf16, #tpu.memory_space<vmem>>, vector<128x256xbf16>
    %cst = arith.constant dense<0.000000e+00> : vector<16x256xf32>
    %2 = tpu.matmul %0, %1, %cst {dimension_numbers = #tpu.dot_dimension_numbers<[1], [0], [0], [1], [0, 0, 1, 1], [], []>} : vector<16x128xbf16>, vector<128x256xbf16>, vector<16x256xf32> -> vector<16x256xf32>
    %c0_3 = arith.constant 0 : index
    %c0_4 = arith.constant 0 : index
    %3 = vector.load %arg4[%c0_3, %c0_4] : memref<1x256xf32, #tpu.memory_space<vmem>>, vector<1x256xf32>
    %4 = vector.broadcast %3 : vector<1x256xf32> to vector<16x256xf32>
    %5 = arith.mulf %2, %4 : vector<16x256xf32>
    %c0_5 = arith.constant 0 : index
    %c0_6 = arith.constant 0 : index
    %6 = vector.load %arg5[%c0_5, %c0_6] : memref<1x256xf32, #tpu.memory_space<vmem>>, vector<1x256xf32>
    %7 = vector.broadcast %6 : vector<1x256xf32> to vector<16x256xf32>
    %8 = arith.addf %5, %7 : vector<16x256xf32>
    %cst_7 = arith.constant 0.000000e+00 : f32
    %9 = vector.broadcast %cst_7 : f32 to vector<16x256xf32>
    %10 = arith.maximumf %8, %9 : vector<16x256xf32>
    %c0_8 = arith.constant 0 : index
    %c0_9 = arith.constant 0 : index
    %11 = vector.load %arg6[%c0_8, %c0_9] : memref<16x256xf32, #tpu.memory_space<vmem>>, vector<16x256xf32>
    tpu.vector_store %arg6[%c0_8, %c0_9], %10 {strides = array<i32>} : memref<16x256xf32, #tpu.memory_space<vmem>>, vector<16x256xf32>,
    return
  }
  func.func @transform_0(%arg0: i32, %arg1: i32) -> (i32, i32) {
    %c0_i32 = arith.constant 0 : i32
    %c0_i32_0 = arith.constant 0 : i32
    return %arg0, %c0_i32 : i32, i32
  }
  func.func @transform_1(%arg0: i32, %arg1: i32) -> (i32, i32) {
    %c0_i32 = arith.constant 0 : i32
    %c0_i32_0 = arith.constant 0 : i32
    return %c0_i32, %arg1 : i32, i32
  }
  func.func @transform_2(%arg0: i32, %arg1: i32) -> (i32, i32) {
    %c0_i32 = arith.constant 0 : i32
    %c0_i32_0 = arith.constant 0 : i32
    return %c0_i32, %arg1 : i32, i32
  }
  func.func @transform_3(%arg0: i32, %arg1: i32) -> (i32, i32) {
    %c0_i32 = arith.constant 0 : i32
    %c0_i32_0 = arith.constant 0 : i32
    return %c0_i32, %arg1 : i32, i32
  }
  func.func @transform_4(%arg0: i32, %arg1: i32) -> (i32, i32) {
    %c0_i32 = arith.constant 0 : i32
    return %arg0, %arg1 : i32, i32
  }
}

module attributes {stable_mosaic.version = 11 : i64} {
  func.func @_gemm_affine_kernel(%arg0: i32, %arg1: i32, %arg2: memref<16x512xbf16, #tpu.memory_space<vmem>>, %arg3: memref<512x256xbf16, #tpu.memory_space<vmem>>, %arg4: memref<1x256xf32, #tpu.memory_space<vmem>>, %arg5: memref<1x256xf32, #tpu.memory_space<vmem>>, %arg6: memref<16x256xf32, #tpu.memory_space<vmem>>) attributes {dimension_semantics = [#tpu.dimension_semantics<parallel>, #tpu.dimension_semantics<parallel>], iteration_bounds = array<i64: 1, 1>, scalar_prefetch = 0 : i64, scratch_operands = 0 : i64, tpu.core_type = #tpu.core_type<tc>, window_params = [{transform_indices = @transform_0, window_bounds = array<i64: 16, 512>}, {transform_indices = @transform_1, window_bounds = array<i64: 512, 256>}, {transform_indices = @transform_2, window_bounds = array<i64: 1, 256>}, {transform_indices = @transform_3, window_bounds = array<i64: 1, 256>}, {transform_indices = @transform_4, window_bounds = array<i64: 16, 256>}]} {
    %c0 = arith.constant 0 : index
    %c0_0 = arith.constant 0 : index
    %0 = vector.load %arg2[%c0, %c0_0] : memref<16x512xbf16, #tpu.memory_space<vmem>>, vector<16x512xbf16>
    %c0_1 = arith.constant 0 : index
    %c0_2 = arith.constant 0 : index
    %1 = vector.load %arg3[%c0_1, %c0_2] : memref<512x256xbf16, #tpu.memory_space<vmem>>, vector<512x256xbf16>
    %cst = arith.constant dense<0.000000e+00> : vector<16x256xf32>
    %2 = tpu.matmul %0, %1, %cst {dimension_numbers = #tpu.dot_dimension_numbers<[1], [0], [0], [1], [0, 0, 1, 1], [], []>} : vector<16x512xbf16>, vector<512x256xbf16>, vector<16x256xf32> -> vector<16x256xf32>
    %c0_3 = arith.constant 0 : index
    %c0_4 = arith.constant 0 : index
    %3 = vector.load %arg4[%c0_3, %c0_4] : memref<1x256xf32, #tpu.memory_space<vmem>>, vector<1x256xf32>
    %4 = vector.broadcast %3 : vector<1x256xf32> to vector<16x256xf32>
    %5 = arith.mulf %2, %4 : vector<16x256xf32>
    %c0_5 = arith.constant 0 : index
    %c0_6 = arith.constant 0 : index
    %6 = vector.load %arg5[%c0_5, %c0_6] : memref<1x256xf32, #tpu.memory_space<vmem>>, vector<1x256xf32>
    %7 = vector.broadcast %6 : vector<1x256xf32> to vector<16x256xf32>
    %8 = arith.addf %5, %7 : vector<16x256xf32>
    %cst_7 = arith.constant 0.000000e+00 : f32
    %9 = vector.broadcast %cst_7 : f32 to vector<16x256xf32>
    %10 = arith.maximumf %8, %9 : vector<16x256xf32>
    %c0_8 = arith.constant 0 : index
    %c0_9 = arith.constant 0 : index
    %11 = vector.load %arg6[%c0_8, %c0_9] : memref<16x256xf32, #tpu.memory_space<vmem>>, vector<16x256xf32>
    tpu.vector_store %arg6[%c0_8, %c0_9], %10 {strides = array<i32>} : memref<16x256xf32, #tpu.memory_space<vmem>>, vector<16x256xf32>,
    return
  }
  func.func @transform_0(%arg0: i32, %arg1: i32) -> (i32, i32) {
    %c0_i32 = arith.constant 0 : i32
    %c0_i32_0 = arith.constant 0 : i32
    return %arg0, %c0_i32 : i32, i32
  }
  func.func @transform_1(%arg0: i32, %arg1: i32) -> (i32, i32) {
    %c0_i32 = arith.constant 0 : i32
    %c0_i32_0 = arith.constant 0 : i32
    return %c0_i32, %arg1 : i32, i32
  }
  func.func @transform_2(%arg0: i32, %arg1: i32) -> (i32, i32) {
    %c0_i32 = arith.constant 0 : i32
    %c0_i32_0 = arith.constant 0 : i32
    return %c0_i32, %arg1 : i32, i32
  }
  func.func @transform_3(%arg0: i32, %arg1: i32) -> (i32, i32) {
    %c0_i32 = arith.constant 0 : i32
    %c0_i32_0 = arith.constant 0 : i32
    return %c0_i32, %arg1 : i32, i32
  }
  func.func @transform_4(%arg0: i32, %arg1: i32) -> (i32, i32) {
    %c0_i32 = arith.constant 0 : i32
    return %arg0, %arg1 : i32, i32
  }
}

module attributes {stable_mosaic.version = 11 : i64} {
  func.func @_gemm_affine_kernel(%arg0: i32, %arg1: i32, %arg2: memref<16x256xbf16, #tpu.memory_space<vmem>>, %arg3: memref<256x128xbf16, #tpu.memory_space<vmem>>, %arg4: memref<1x128xf32, #tpu.memory_space<vmem>>, %arg5: memref<1x128xf32, #tpu.memory_space<vmem>>, %arg6: memref<16x128xf32, #tpu.memory_space<vmem>>) attributes {dimension_semantics = [#tpu.dimension_semantics<parallel>, #tpu.dimension_semantics<parallel>], iteration_bounds = array<i64: 1, 1>, scalar_prefetch = 0 : i64, scratch_operands = 0 : i64, tpu.core_type = #tpu.core_type<tc>, window_params = [{transform_indices = @transform_0, window_bounds = array<i64: 16, 256>}, {transform_indices = @transform_1, window_bounds = array<i64: 256, 128>}, {transform_indices = @transform_2, window_bounds = array<i64: 1, 128>}, {transform_indices = @transform_3, window_bounds = array<i64: 1, 128>}, {transform_indices = @transform_4, window_bounds = array<i64: 16, 128>}]} {
    %c0 = arith.constant 0 : index
    %c0_0 = arith.constant 0 : index
    %0 = vector.load %arg2[%c0, %c0_0] : memref<16x256xbf16, #tpu.memory_space<vmem>>, vector<16x256xbf16>
    %c0_1 = arith.constant 0 : index
    %c0_2 = arith.constant 0 : index
    %1 = vector.load %arg3[%c0_1, %c0_2] : memref<256x128xbf16, #tpu.memory_space<vmem>>, vector<256x128xbf16>
    %cst = arith.constant dense<0.000000e+00> : vector<16x128xf32>
    %2 = tpu.matmul %0, %1, %cst {dimension_numbers = #tpu.dot_dimension_numbers<[1], [0], [0], [1], [0, 0, 1, 1], [], []>} : vector<16x256xbf16>, vector<256x128xbf16>, vector<16x128xf32> -> vector<16x128xf32>
    %c0_3 = arith.constant 0 : index
    %c0_4 = arith.constant 0 : index
    %3 = vector.load %arg4[%c0_3, %c0_4] : memref<1x128xf32, #tpu.memory_space<vmem>>, vector<1x128xf32>
    %4 = vector.broadcast %3 : vector<1x128xf32> to vector<16x128xf32>
    %5 = arith.mulf %2, %4 : vector<16x128xf32>
    %c0_5 = arith.constant 0 : index
    %c0_6 = arith.constant 0 : index
    %6 = vector.load %arg5[%c0_5, %c0_6] : memref<1x128xf32, #tpu.memory_space<vmem>>, vector<1x128xf32>
    %7 = vector.broadcast %6 : vector<1x128xf32> to vector<16x128xf32>
    %8 = arith.addf %5, %7 : vector<16x128xf32>
    %c0_7 = arith.constant 0 : index
    %c0_8 = arith.constant 0 : index
    %9 = vector.load %arg6[%c0_7, %c0_8] : memref<16x128xf32, #tpu.memory_space<vmem>>, vector<16x128xf32>
    tpu.vector_store %arg6[%c0_7, %c0_8], %8 {strides = array<i32>} : memref<16x128xf32, #tpu.memory_space<vmem>>, vector<16x128xf32>,
    return
  }
  func.func @transform_0(%arg0: i32, %arg1: i32) -> (i32, i32) {
    %c0_i32 = arith.constant 0 : i32
    %c0_i32_0 = arith.constant 0 : i32
    return %arg0, %c0_i32 : i32, i32
  }
  func.func @transform_1(%arg0: i32, %arg1: i32) -> (i32, i32) {
    %c0_i32 = arith.constant 0 : i32
    %c0_i32_0 = arith.constant 0 : i32
    return %c0_i32, %arg1 : i32, i32
  }
  func.func @transform_2(%arg0: i32, %arg1: i32) -> (i32, i32) {
    %c0_i32 = arith.constant 0 : i32
    %c0_i32_0 = arith.constant 0 : i32
    return %c0_i32, %arg1 : i32, i32
  }
  func.func @transform_3(%arg0: i32, %arg1: i32) -> (i32, i32) {
    %c0_i32 = arith.constant 0 : i32
    %c0_i32_0 = arith.constant 0 : i32
    return %c0_i32, %arg1 : i32, i32
  }
  func.func @transform_4(%arg0: i32, %arg1: i32) -> (i32, i32) {
    %c0_i32 = arith.constant 0 : i32
    return %arg0, %arg1 : i32, i32
  }
}

</mosaic_0001>

<bundles_post_ra>
// kernel: classifier_forward.3
= control target key start
LH: loop header
LB: loop body
LE: loop exit
PB: predicated region body
PF: predicated region fallthrough
CT: control target
= control target key end

     0   :  { %9 = vsyncpa [#allocation3], 0  ;;  %s1016_s0 = inlined_call_operand.vmem [shape: bf16[16,128], index: 0, kind: input, shape index: {}]   ;;  %s1017_s1 = inlined_call_operand.hbm [shape: bf16[128,512], index: 1, kind: input, shape index: {}]   ;;  %s1018_s2 = inlined_call_operand.vmem [shape: f32[1,512], index: 2, kind: input, shape index: {}]   ;;  %s1019_s3 = inlined_call_operand.vmem [shape: f32[1,512], index: 3, kind: input, shape index: {}]   ;;  %s1020_s4 = inlined_call_operand.vmem [shape: f32[16,512], index: 4, kind: output, shape index: {}]  }
   0x1   :  { %11 = vsyncpa [#allocation3 + $0x1], 0  ;;  %s852_s15 = smov 0   ;;  %s854_s16 = smov 0  }
   0x2   :  { %s856_s17 = smov 0   ;;  %s858_s18 = smov 0  }
   0x3   :  { %s860_s19 = smov 0   ;;  %s862_s20 = smov 0  }
   0x4 LB: > { %s619_s21 = sadd.s32 4294967295, %s820_s20   ;;  %s26_s22 = sadd.s32 1, %s816_s19  ;;  %s820_s20 = sphi %s862_s20, %s17_s20   ;;  %s816_s19 = sphi %s860_s19, %s1031_s19   ;;  %s812_s18 = sphi %s858_s18, %s1030_s18   ;;  %s808_s17 = sphi %s856_s17, %s1029_s17   ;;  %s804_s16 = sphi %s854_s16, %s1028_s16   ;;  %s800_s15 = sphi %s852_s15, %s1027_s15  }
   0x5   : > { %p27_p0 = scmp.ge.s32.totalorder %s26_s22, 2  ;;  %s62_s23 = sadd.s32 1, %s808_s17 }
   0x6   : > { %p69_p1 = scmp.ne.s32.totalorder %s808_s17, %s804_s16  ;;  %p70_p2 = scmp.eq.s32.totalorder %s820_s20, 0 }
   0x7   : > { %s1033_s22 = smov (%p27_p0, %s26_s22), 0  ;;  %p75_p4 = scmp.ne.s32.totalorder %s804_s16, %s800_s15 }
   0x8   : > { %p888_p3 = por %p70_p2, %p69_p1  ;;  %s59_s25 = ssub.s32 %s816_s19, %s1033_s22 }
   0x9   : > { %p76_p5 = scmp.eq.s32.totalorder %s619_s21, 0  ;;  %p60_p6 = scmp.eq.s32.totalorder %s59_s25, 0 }
   0xa   : > { %p153_p7 = scmp.eq.s32.totalorder %s619_s21, 1  ;;  %p662_p10 = scmp.lt.s32.totalorder %s820_s20, 2 }
   0xb   : > { %p895_p8 = por %p76_p5, %p75_p4  ;;  %s188_s29 = sand.u32 1, %s808_s17  }
   0xc   : > { %s900_s27 = scalar_select %p60_p6, %s808_s17, %s62_s23  }
   0xd   : > { %p902_p9 = por %p153_p7, %p69_p1  ;;  %s654_s30 = sshll.u32 %s816_s19, 7 }
   0xe   : > { %s624_s5 = sshll.u32 %s188_s29, 7  ;;  %s912_s8 = scalar_lea.hbm %s1017_s1, %s654_s30 }
   0xf   : > { %s1023_s28 = scalar_select %p902_p9, 1, 0 }
  0x10   : > { %s192_s9 = scalar_lea.vmem [#allocation2], %s624_s5  ;;  %p916_p11 = pnand %p662_p10, %p888_p3 }
  0x11   : > { %s199_s10 = sshll.u32 %s192_s9, 4  ;;  %s923_s12 = scalar_lea.sflag [#allocation3], %s188_s29  ;;  %s920_s10 = int_to_ptr.vmem [resolvable:$true] %s199_s10 }
  0x12   : > { %s740_s13 = scalar_lea.hbm %s912_s8, 2048  ;;  %p742_p0 = pneg %p916_p11 }
  0x13   : > { %p741_p13 = scmp.ne.s32.totalorder %s912_s8, %s740_s13  ;;  %s745_s21 = scalar_lea.hbm %s1017_s1, 4096 }
  0x14   : > { %p746_p3 = scmp.lt.u32.totalorder %s912_s8, %s1017_s1  ;;  %p747_p4 = scmp.lt.u32.totalorder %s745_s21, %s740_s13 }
  0x15   : > { %p743_p1 = pnand %p742_p0, %p741_p13  ;;  %p749_p6 = scmp.lt.u32.totalorder %s740_s13, %s912_s8 }
  0x16   : > { %p748_p5 = por %p747_p4, %p746_p3 }
  0x17   : > { %p744_p2 = pneg %p743_p1 }
  0x18   : > { %p750_p7 = por %p749_p6, %p748_p5 }
  0x1a   : > { %p751_p10 = pnand %p750_p7, %p744_p2 }
  0x1c   : > { %754 = shalt.err (!%p751_p10)
}
  0x1d   : > { %s755_s25 = scalar_lea.vmem %s920_s10, 2048  ;;  %s822_s29 = smov [#allocation2]  }
  0x1e   : > { %p756_p13 = scmp.ne.s32.totalorder %s920_s10, %s755_s25  ;;  %s760_s30 = sshll.u32 %s822_s29, 4  ;;  %s761_s30 = int_to_ptr.vmem [resolvable:$false] %s760_s30 }
  0x1f   : > { %s762_s5 = scalar_lea.vmem %s761_s30, 4096  ;;  %p763_p9 = scmp.lt.s32.totalorder %s920_s10, %s761_s30 }
  0x20   : > { %p758_p1 = pnand %p756_p13, %p742_p0  ;;  %p764_p3 = scmp.lt.s32.totalorder %s762_s5, %s755_s25 }
  0x22   : > { %p759_p12 = pneg %p758_p1  ;;  %p765_p4 = por %p764_p3, %p763_p9 }
  0x24   : > { %p766_p5 = pnand %p765_p4, %p759_p12 }
  0x26   : > { %769 = shalt.err (!%p766_p5)
}
  0x27   : > { %s823_s6 = smov 256   ;;  %s824_s7 = smov 128  }
  0x28   : > { %s825_s9 = smov 8   ;;  %p223_p0 = scmp.lt.s32.totalorder %s820_s20, 3 }
  0x29   : > { %661 = dma.hbm_to_vmem [thread:$0]  (!%p916_p11), %s912_s8, 2048, %s920_s10, %s923_s12, %s823_s6, %s824_s7, %s825_s9  }
  0x2a   : > { %p1025_p2 = scmp.ge.s32.totalorder %s820_s20, 1 }
  0x2c   : > { %p224_p6 = pnand %p1025_p2, %p223_p0 }
  0x2d   : > { %s955_s13 = sand.u32 (!%p224_p6), 1, %s804_s16  }
  0x2e   : > { %227 = sbr.rel (%p224_p6) target bundleno = 317 (0x13d), region = 36  ;;  %s628_s14 = sshll.u32 (!%p224_p6), %s955_s13, 7 }
  0x2f   : > { %s230_s15 = scalar_lea.sflag (!%p224_p6), [#allocation3], %s955_s13  ;;  %s959_s21 = scalar_lea.vmem (!%p224_p6), [#allocation2], %s628_s14 }
  0x35   : > { %795 = dma.done.wait (%p895_p8), %s230_s15, 2048  }
  0x36   : > { %797 = vsyncadd (%p895_p8), %s230_s15, 4294965248  ;;  %v826_v0 = vmov 0   ;;  %v715_v1 = vld [vmem:[%s959_s21 + $0x4] ss:$8 sps:$4 sm:$0xff]   ;;  %v717_v2 = vld [vmem:[%s959_s21] ss:$8 sps:$4 sm:$0xff]   ;;  %v439_v18 = vlaneseq }
  0x37   : > { %426 = vmatprep.mubr.bf16.mxu0 %v826_v0  ;;  %394 = vmatprep.subr.bf16.mxu0 %v715_v1  ;;  %v718_v3 = vld [vmem:[%s959_s21 + $0x14] ss:$8 sps:$4 sm:$0xff]   ;;  %v720_v4 = vld [vmem:[%s959_s21 + $0x10] ss:$8 sps:$4 sm:$0xff]   ;;  %v721_v5 = vld [vmem:[%s959_s21 + $0x24] ss:$8 sps:$4 sm:$0xff]  }
  0x38   : > { %395 = vmatpush1.bf16.msra.mxu0 %v717_v2  ;;  %v723_v6 = vld [vmem:[%s959_s21 + $0x20] ss:$8 sps:$4 sm:$0xff]   ;;  %v724_v7 = vld [vmem:[%s959_s21 + $0x34] ss:$8 sps:$4 sm:$0xff]   ;;  %v726_v8 = vld [vmem:[%s959_s21 + $0x30] ss:$8 sps:$4 sm:$0xff]  }
  0x39   : > { %396 = vmatprep.subr.bf16.mxu0 %v718_v3  ;;  %v727_v9 = vld [vmem:[%s959_s21 + $0x44] ss:$8 sps:$4 sm:$0xff]   ;;  %v729_v10 = vld [vmem:[%s959_s21 + $0x40] ss:$8 sps:$4 sm:$0xff]   ;;  %v730_v11 = vld [vmem:[%s959_s21 + $0x54] ss:$8 sps:$4 sm:$0xff]  }
  0x3a   : > { %v732_v12 = vld [vmem:[%s959_s21 + $0x50] ss:$8 sps:$4 sm:$0xff]   ;;  %v733_v13 = vld [vmem:[%s959_s21 + $0x64] ss:$8 sps:$4 sm:$0xff]   ;;  %v735_v14 = vld [vmem:[%s959_s21 + $0x60] ss:$8 sps:$4 sm:$0xff]  }
  0x3b   : > { %v736_v15 = vld [vmem:[%s959_s21 + $0x74] ss:$8 sps:$4 sm:$0xff]   ;;  %v738_v16 = vld [vmem:[%s959_s21 + $0x70] ss:$8 sps:$4 sm:$0xff]   ;;  %v739_v17 = vld [vmem:[%s1016_s0] sm:$0xff]   ;;  %s630_s10 = sshll.u32 %s812_s18, 1 }
  0x3c   : > { %397 = vmatpush1.bf16.msra.mxu0 %v720_v4  ;;  %p278_p8 = scmp.lt.s32.totalorder %s630_s10, 3  ;;  %v440_v19 = vshrl.u32 %v439_v18, 7  ;;  %s629_s30 = sshll.u32 %s955_s13, 5 }
  0x3d   : > { %398 = vmatprep.subr.bf16.mxu0 %v721_v5  ;;  %s269_s5 = scalar_lea.vmem [#allocation4], %s629_s30  ;;  %p1026_p9 = scmp.ne.s32.totalorder %s1023_s28, 0 }
  0x3e   : > { %s1035_s10 = smov (!%p278_p8, %s630_s10), 3  ;;  %v441_v20 = vsub.s32 0, %v440_v19  ;;  %v445_v22 = vsub.s32 1, %v440_v19  ;;  %s655_s6 = sshll.u32 (%p1026_p9), %s812_s18, 4 }
  0x3f   : > { %s280_s23 = scalar_lea.vmem %s1018_s2, %s1035_s10  ;;  %s285_s29 = scalar_lea.vmem %s1019_s3, %s1035_s10 }
  0x40   : > { %399 = vmatpush1.bf16.msra.mxu0 %v723_v6  ;;  %v437_v21 = vld [vmem:[%s280_s23] sm:$0x3]  ;;  %s489_s13 = scalar_lea.vmem (%p1026_p9), %s1020_s4, %s655_s6 }
  0x41   : > { %400 = vmatprep.subr.bf16.mxu0 %v724_v7  ;;  %v453_v23 = vld [vmem:[%s285_s29] sm:$0x3]  ;;  %v442_v24 = vrot.slane %v437_v21, %v441_v20  ;;  %v446_v25 = vrot.slane %v437_v21, %v445_v22 }
  0x42   : > { %v458_v26 = vrot.slane %v453_v23, %v441_v20  ;;  %v462_v28 = vrot.slane %v453_v23, %v445_v22 }
  0x44   : > { %401 = vmatpush1.bf16.msra.mxu0 %v726_v8 }
  0x45   : > { %402 = vmatprep.subr.bf16.mxu0 %v727_v9 }
  0x48   : > { %403 = vmatpush1.bf16.msra.mxu0 %v729_v10 }
  0x49   : > { %404 = vmatprep.subr.bf16.mxu0 %v730_v11 }
  0x4c   : > { %405 = vmatpush1.bf16.msra.mxu0 %v732_v12 }
  0x4d   : > { %406 = vmatprep.subr.bf16.mxu0 %v733_v13 }
  0x50   : > { %407 = vmatpush1.bf16.msra.mxu0 %v735_v14 }
  0x51   : > { %408 = vmatprep.subr.bf16.mxu0 %v736_v15 }
  0x54   : > { %409 = vmatpush1.bf16.msra.mxu0 %v738_v16 }
  0x57   : > { %427 = vmatmul.mubr.bf16.vlgmr.msra.gmra.mrb[0].mxu0 %v739_v17 }
 0x12a   : > { %v428_v27 = vpop.f32.mrb[0].mxu0 }
 0x12b   : > { %v449_v29 = vmul.f32 %v442_v24, %v428_v27  ;;  %v430_v30 = vpop.f32.mrb[1].mxu0 }
 0x12c   : > { %v450_v31 = vmul.f32 %v446_v25, %v430_v30  ;;  %v432_v32 = vpop.f32.mrb[2].mxu0 }
 0x12d   : > { %v465_v33 = vadd.f32 %v458_v26, %v449_v29  ;;  %v451_v34 = vmul.f32 %v442_v24, %v432_v32  ;;  %v434_v35 = vpop.f32.mrb[3].mxu0 }
 0x12e   : > { %v466_v36 = vadd.f32 %v462_v28, %v450_v31  ;;  %v452_v37 = vmul.f32 %v446_v25, %v434_v35  ;;  %483 = sbr.rel (!%p1026_p9) target bundleno = 317 (0x13d), region = 44 }
 0x12f   : > { %v469_v38 = vmax.f32 %v465_v33, 0.0  ;;  %v467_v39 = vadd.f32 %v458_v26, %v451_v34 }
 0x130   : > { %v470_v40 = vmax.f32 %v466_v36, 0.0  ;;  %v468_v41 = vadd.f32 %v462_v28, %v452_v37 }
 0x131   : > { %473 = vst [vmem:[%s269_s5] sm:$0xff] %v469_v38  ;;  %v471_v42 = vmax.f32 %v467_v39, 0.0 }
 0x132   : > { %474 = vst [vmem:[%s269_s5 + $0x8] sm:$0xff] %v470_v40  ;;  %v472_v43 = vmax.f32 %v468_v41, 0.0 }
 0x133   : > { %475 = vst [vmem:[%s269_s5 + $0x10] sm:$0xff] %v471_v42 }
 0x134   : > { %476 = vst [vmem:[%s269_s5 + $0x18] sm:$0xff] %v472_v43 }
 0x138   : > { %v502_v44 = vld [vmem:[%s269_s5] sm:$0xff] }
 0x139   : > { %v504_v45 = vld [vmem:[%s269_s5 + $0x8] sm:$0xff]  ;;  %503 = vst [vmem:[%s489_s13] sm:$0xff] %v502_v44 }
 0x13a   : > { %v506_v46 = vld [vmem:[%s269_s5 + $0x10] sm:$0xff]  ;;  %505 = vst [vmem:[%s489_s13 + $0x8] sm:$0xff] %v504_v45 }
 0x13b   : > { %v508_v47 = vld [vmem:[%s269_s5 + $0x18] sm:$0xff]  ;;  %507 = vst [vmem:[%s489_s13 + $0x20] sm:$0xff] %v506_v46 }
 0x13c   : > { %509 = vst [vmem:[%s489_s13 + $0x28] sm:$0xff] %v508_v47 }
 0x13d PF: > { %s17_s20 = sadd.s32 1, %s820_s20   ;;  %s1027_s15 = smov %s804_s16 }
 0x13e   : > { %p14_p11 = scmp.ge.s32.totalorder %s17_s20, 4   ;;  %s1028_s16 = smov %s808_s17 }
 0x13f   : > { %s1029_s17 = smov %s900_s27  ;;  %s1030_s18 = smov %s816_s19 }
 0x140   : > { %s1031_s19 = smov %s1033_s22  ;;  %16 = sbr.rel (!%p14_p11) target bundleno = 4 (0x4), region = 108 }
 0x147   :  { %525 = vsyncpa [#allocation3], 1 }
 0x148   :  { %527 = vsyncpa [#allocation3 + $0x1], 1 }

// kernel: classifier_forward.5
= control target key start
LH: loop header
LB: loop body
LE: loop exit
PB: predicated region body
PF: predicated region fallthrough
CT: control target
= control target key end

     0   :  { %s375_s1 = inlined_call_operand.vmem [shape: bf16[256,128], index: 1, kind: input, shape index: {}]   ;;  %s376_s0 = inlined_call_operand.vmem [shape: bf16[16,256], index: 0, kind: input, shape index: {}]   ;;  %s377_s2 = inlined_call_operand.vmem [shape: f32[1,128], index: 2, kind: input, shape index: {}]   ;;  %s378_s3 = inlined_call_operand.vmem [shape: f32[1,128], index: 3, kind: input, shape index: {}]   ;;  %s379_s4 = inlined_call_operand.vmem [shape: f32[16,128], index: 4, kind: output, shape index: {}]  }
   0x1   :  { %v265_v0 = vld [vmem:[%s375_s1 + $0x40] sm:$0xff]   ;;  %v267_v2 = vld [vmem:[%s375_s1 + $0x48] sm:$0xff]   ;;  %v269_v4 = vld [vmem:[%s375_s1 + $0x50] sm:$0xff]  }
   0x2   :  { %v266_v1 = vld [vmem:[%s375_s1] sm:$0xff]   ;;  %243 = vmatprep.subr.bf16.mxu0 %v265_v0  ;;  %v268_v3 = vld [vmem:[%s375_s1 + $0x8] sm:$0xff]   ;;  %v270_v5 = vld [vmem:[%s375_s1 + $0x10] sm:$0xff]  }
   0x3   :  { %244 = vmatpush3.bf16.msra.mxu0 %v266_v1  ;;  %v271_v6 = vld [vmem:[%s375_s1 + $0x58] sm:$0xff]   ;;  %v273_v8 = vld [vmem:[%s375_s1 + $0x60] sm:$0xff]   ;;  %v275_v10 = vld [vmem:[%s375_s1 + $0x68] sm:$0xff]  }
   0x4   :  { %245 = vmatprep.subr.bf16.mxu0 %v267_v2  ;;  %v272_v7 = vld [vmem:[%s375_s1 + $0x18] sm:$0xff]   ;;  %v274_v9 = vld [vmem:[%s375_s1 + $0x20] sm:$0xff]   ;;  %v276_v12 = vld [vmem:[%s375_s1 + $0x28] sm:$0xff]  }
   0x5   :  { %v283_v11 = vld [vmem:[%s376_s0 + $0x4] ss:$8 sps:$4 sm:$0xff]   ;;  %v277_v13 = vld [vmem:[%s375_s1 + $0x70] sm:$0xff]   ;;  %v279_v15 = vld [vmem:[%s375_s1 + $0x78] sm:$0xff]  }
   0x6   :  { %190 = vmatprep.mubr.bf16.mxu0 %v283_v11  ;;  %v278_v14 = vld [vmem:[%s375_s1 + $0x30] sm:$0xff]   ;;  %v280_v16 = vld [vmem:[%s375_s1 + $0x38] sm:$0xff]   ;;  %v281_v17 = vld [vmem:[%s376_s0] ss:$8 sps:$4 sm:$0xff]  }
   0x7   :  { %246 = vmatpush3.bf16.msra.mxu0 %v268_v3  ;;  %v241_v20 = vld [vmem:[%s377_s2] ss:$0 sm:$0xff] }
   0x8   :  { %247 = vmatprep.subr.bf16.mxu0 %v269_v4  ;;  %v242_v23 = vld [vmem:[%s378_s3] ss:$0 sm:$0xff] }
   0xb   :  { %248 = vmatpush3.bf16.msra.mxu0 %v270_v5 }
   0xc   :  { %249 = vmatprep.subr.bf16.mxu0 %v271_v6 }
   0xf   :  { %250 = vmatpush3.bf16.msra.mxu0 %v272_v7 }
  0x10   :  { %251 = vmatprep.subr.bf16.mxu0 %v273_v8 }
  0x13   :  { %252 = vmatpush3.bf16.msra.mxu0 %v274_v9 }
  0x14   :  { %253 = vmatprep.subr.bf16.mxu0 %v275_v10 }
  0x17   :  { %254 = vmatpush3.bf16.msra.mxu0 %v276_v12 }
  0x18   :  { %255 = vmatprep.subr.bf16.mxu0 %v277_v13 }
  0x1b   :  { %256 = vmatpush3.bf16.msra.mxu0 %v278_v14 }
  0x1c   :  { %257 = vmatprep.subr.bf16.mxu0 %v279_v15 }
  0x1f   :  { %258 = vmatpush3.bf16.msra.mxu0 %v280_v16 }
  0x22   :  { %191 = vmatmul.mubr.bf16.vlgmr.msra.gmra.mrb[0].mxu0 %v281_v17 }
  0xf5   :  { %v259_v18 = vpop.f32.mrb[0].mxu0 }
  0xf6   :  { %v260_v19 = vpop.f32.mrb[1].mxu0 }
  0xf7   :  { %v261_v21 = vadd.f32 %v260_v19, %v259_v18  ;;  %v262_v22 = vpop.f32.mrb[2].mxu0 }
  0xf8   :  { %v263_v24 = vpop.f32.mrb[3].mxu0 }
  0xf9   :  { %v206_v25 = vmul.f32 %v261_v21, %v241_v20  ;;  %v264_v26 = vadd.f32 %v263_v24, %v262_v22 }
  0xfb   :  { %v215_v27 = vadd.f32 %v242_v23, %v206_v25  ;;  %v207_v28 = vmul.f32 %v264_v26, %v241_v20 }
  0xfd   :  { %217 = vst [vmem:[%s379_s4] sm:$0xff] %v215_v27  ;;  %v216_v29 = vadd.f32 %v242_v23, %v207_v28 }
  0xff   :  { %218 = vst [vmem:[%s379_s4 + $0x8] sm:$0xff] %v216_v29 }

// kernel: classifier_forward.4
= control target key start
LH: loop header
LB: loop body
LE: loop exit
PB: predicated region body
PF: predicated region fallthrough
CT: control target
= control target key end

     0   :  { %9 = vsyncpa [#allocation3], 0  ;;  %s771_s15 = smov [#allocation2]   ;;  %s841_s0 = inlined_call_operand.vmem [shape: bf16[16,512], index: 0, kind: input, shape index: {}]   ;;  %s842_s1 = inlined_call_operand.hbm [shape: bf16[512,256], index: 1, kind: input, shape index: {}]   ;;  %s843_s2 = inlined_call_operand.vmem [shape: f32[1,256], index: 2, kind: input, shape index: {}]   ;;  %s844_s3 = inlined_call_operand.vmem [shape: f32[1,256], index: 3, kind: input, shape index: {}]   ;;  %s845_s4 = inlined_call_operand.vmem [shape: f32[16,256], index: 4, kind: output, shape index: {}]  }
   0x1   :  { %s17_s16 = sshll.u32 %s771_s15, 4  ;;  %s747_s19 = scalar_lea.hbm %s842_s1, 8192  ;;  %s18_s16 = int_to_ptr.vmem [resolvable:$true] %s17_s16 }
   0x2   :  { %p748_p0 = scmp.ne.s32.totalorder %s842_s1, %s747_s19  ;;  %p751_p1 = scmp.lt.u32.totalorder %s747_s19, %s842_s1 }
   0x4   :  { %p753_p2 = pnand %p751_p1, %p748_p0 }
   0x6   :  { %756 = shalt.err (!%p753_p2)
}
   0x7   :  { %s757_s24 = scalar_lea.vmem %s18_s16, 8192  ;;  %p762_p4 = scmp.lt.s32.totalorder %s18_s16, %s18_s16 }
   0x8   :  { %p758_p3 = scmp.ne.s32.totalorder %s18_s16, %s757_s24  ;;  %p763_p5 = scmp.lt.s32.totalorder %s757_s24, %s757_s24 }
   0xa   :  { %p764_p6 = por %p763_p5, %p762_p4 }
   0xc   :  { %p765_p7 = pnand %p764_p6, %p758_p3 }
   0xe   :  { %768 = shalt.err (!%p765_p7)
}
   0xf   :  { %s772_s25 = smov 128   ;;  %s773_s26 = smov 8  }
  0x10   :  { %23 = dma.hbm_to_vmem [thread:$0]  %s842_s1, 8192, %s18_s16, [#allocation3], %s772_s25, %s772_s25, %s773_s26  }
  0x11   :  { %769 = dma.done.wait [#allocation3], 8192  }
  0x12   :  { %770 = vsyncadd [#allocation3], 4294959104  ;;  %v645_v0 = vld [vmem:[#allocation2 + $0x4] ss:$8 sps:$4 sm:$0xff]   ;;  %v649_v2 = vld [vmem:[#allocation2] ss:$8 sps:$4 sm:$0xff]  }
  0x13   :  { %v647_v1 = vld [vmem:[#allocation2 + $0x104] ss:$8 sps:$4 sm:$0xff]   ;;  %439 = vmatprep.subr.bf16.mxu1 %v645_v0  ;;  %v650_v3 = vld [vmem:[#allocation2 + $0x100] ss:$8 sps:$4 sm:$0xff]   ;;  %v651_v4 = vld [vmem:[#allocation2 + $0x14] ss:$8 sps:$4 sm:$0xff]  }
  0x14   :  { %482 = vmatprep.subr.bf16.mxu0 %v647_v1  ;;  %440 = vmatpush1.bf16.msra.mxu1 %v649_v2  ;;  %v653_v5 = vld [vmem:[#allocation2 + $0x114] ss:$8 sps:$4 sm:$0xff]   ;;  %v655_v6 = vld [vmem:[#allocation2 + $0x10] ss:$8 sps:$4 sm:$0xff]   ;;  %v657_v8 = vld [vmem:[#allocation2 + $0x24] ss:$8 sps:$4 sm:$0xff]  }
  0x15   :  { %483 = vmatpush1.bf16.msra.mxu0 %v650_v3  ;;  %441 = vmatprep.subr.bf16.mxu1 %v651_v4  ;;  %v656_v7 = vld [vmem:[#allocation2 + $0x110] ss:$8 sps:$4 sm:$0xff]   ;;  %v659_v9 = vld [vmem:[#allocation2 + $0x124] ss:$8 sps:$4 sm:$0xff]   ;;  %v661_v10 = vld [vmem:[#allocation2 + $0x20] ss:$8 sps:$4 sm:$0xff]   ;;  %v527_v4 = vlaneseq }
  0x16   :  { %484 = vmatprep.subr.bf16.mxu0 %v653_v5  ;;  %v662_v11 = vld [vmem:[#allocation2 + $0x120] ss:$8 sps:$4 sm:$0xff]   ;;  %v663_v12 = vld [vmem:[#allocation2 + $0x34] ss:$8 sps:$4 sm:$0xff]   ;;  %v667_v14 = vld [vmem:[#allocation2 + $0x30] ss:$8 sps:$4 sm:$0xff]  }
  0x17   :  { %v665_v13 = vld [vmem:[#allocation2 + $0x134] ss:$8 sps:$4 sm:$0xff]   ;;  %v668_v15 = vld [vmem:[#allocation2 + $0x130] ss:$8 sps:$4 sm:$0xff]   ;;  %v669_v16 = vld [vmem:[#allocation2 + $0x44] ss:$8 sps:$4 sm:$0xff]  }
  0x18   :  { %442 = vmatpush1.bf16.msra.mxu1 %v655_v6  ;;  %v671_v17 = vld [vmem:[#allocation2 + $0x144] ss:$8 sps:$4 sm:$0xff]   ;;  %v673_v18 = vld [vmem:[#allocation2 + $0x40] ss:$8 sps:$4 sm:$0xff]   ;;  %v675_v20 = vld [vmem:[#allocation2 + $0x54] ss:$8 sps:$4 sm:$0xff]  }
  0x19   :  { %485 = vmatpush1.bf16.msra.mxu0 %v656_v7  ;;  %443 = vmatprep.subr.bf16.mxu1 %v657_v8  ;;  %v674_v19 = vld [vmem:[#allocation2 + $0x140] ss:$8 sps:$4 sm:$0xff]   ;;  %v677_v21 = vld [vmem:[#allocation2 + $0x154] ss:$8 sps:$4 sm:$0xff]   ;;  %v679_v22 = vld [vmem:[#allocation2 + $0x50] ss:$8 sps:$4 sm:$0xff]  }
  0x1a   :  { %486 = vmatprep.subr.bf16.mxu0 %v659_v9  ;;  %v680_v23 = vld [vmem:[#allocation2 + $0x150] ss:$8 sps:$4 sm:$0xff]   ;;  %v681_v24 = vld [vmem:[#allocation2 + $0x64] ss:$8 sps:$4 sm:$0xff]   ;;  %v685_v26 = vld [vmem:[#allocation2 + $0x60] ss:$8 sps:$4 sm:$0xff]  }
  0x1b   :  { %v683_v25 = vld [vmem:[#allocation2 + $0x164] ss:$8 sps:$4 sm:$0xff]   ;;  %v686_v27 = vld [vmem:[#allocation2 + $0x160] ss:$8 sps:$4 sm:$0xff]   ;;  %v687_v28 = vld [vmem:[#allocation2 + $0x74] ss:$8 sps:$4 sm:$0xff]  }
  0x1c   :  { %444 = vmatpush1.bf16.msra.mxu1 %v661_v10  ;;  %v689_v29 = vld [vmem:[#allocation2 + $0x174] ss:$8 sps:$4 sm:$0xff]   ;;  %v691_v30 = vld [vmem:[#allocation2 + $0x70] ss:$8 sps:$4 sm:$0xff]   ;;  %v693_v32 = vld [vmem:[#allocation2 + $0x84] ss:$8 sps:$4 sm:$0xff]  }
  0x1d   :  { %487 = vmatpush1.bf16.msra.mxu0 %v662_v11  ;;  %445 = vmatprep.subr.bf16.mxu1 %v663_v12  ;;  %v692_v31 = vld [vmem:[#allocation2 + $0x170] ss:$8 sps:$4 sm:$0xff]   ;;  %v695_v33 = vld [vmem:[#allocation2 + $0x184] ss:$8 sps:$4 sm:$0xff]   ;;  %v697_v34 = vld [vmem:[#allocation2 + $0x80] ss:$8 sps:$4 sm:$0xff]  }
  0x1e   :  { %488 = vmatprep.subr.bf16.mxu0 %v665_v13  ;;  %v698_v35 = vld [vmem:[#allocation2 + $0x180] ss:$8 sps:$4 sm:$0xff]   ;;  %v699_v36 = vld [vmem:[#allocation2 + $0x94] ss:$8 sps:$4 sm:$0xff]   ;;  %v703_v38 = vld [vmem:[#allocation2 + $0x90] ss:$8 sps:$4 sm:$0xff]  }
  0x1f   :  { %v701_v37 = vld [vmem:[#allocation2 + $0x194] ss:$8 sps:$4 sm:$0xff]   ;;  %v704_v39 = vld [vmem:[#allocation2 + $0x190] ss:$8 sps:$4 sm:$0xff]   ;;  %v705_v40 = vld [vmem:[#allocation2 + $0xa4] ss:$8 sps:$4 sm:$0xff]  }
  0x20   :  { %446 = vmatpush1.bf16.msra.mxu1 %v667_v14  ;;  %v707_v41 = vld [vmem:[#allocation2 + $0x1a4] ss:$8 sps:$4 sm:$0xff]   ;;  %v709_v42 = vld [vmem:[#allocation2 + $0xa0] ss:$8 sps:$4 sm:$0xff]   ;;  %v711_v44 = vld [vmem:[#allocation2 + $0xb4] ss:$8 sps:$4 sm:$0xff]  }
  0x21   :  { %489 = vmatpush1.bf16.msra.mxu0 %v668_v15  ;;  %447 = vmatprep.subr.bf16.mxu1 %v669_v16  ;;  %v710_v43 = vld [vmem:[#allocation2 + $0x1a0] ss:$8 sps:$4 sm:$0xff]   ;;  %v713_v45 = vld [vmem:[#allocation2 + $0x1b4] ss:$8 sps:$4 sm:$0xff]   ;;  %v715_v46 = vld [vmem:[#allocation2 + $0xb0] ss:$8 sps:$4 sm:$0xff]  }
  0x22   :  { %490 = vmatprep.subr.bf16.mxu0 %v671_v17  ;;  %v743_v47 = vld [vmem:[%s841_s0 + $0x4] ss:$16 sps:$4 sm:$0xff]   ;;  %v716_v48 = vld [vmem:[#allocation2 + $0x1b0] ss:$8 sps:$4 sm:$0xff]   ;;  %v746_v51 = vld [vmem:[%s841_s0 + $0xc] ss:$16 sps:$4 sm:$0xff]  }
  0x23   :  { %v717_v49 = vld [vmem:[#allocation2 + $0xc4] ss:$8 sps:$4 sm:$0xff]   ;;  %471 = vmatprep.mubr.bf16.mxu1 %v743_v47  ;;  %514 = vmatprep.mubr.bf16.mxu0 %v746_v51  ;;  %v721_v52 = vld [vmem:[#allocation2 + $0xc0] ss:$8 sps:$4 sm:$0xff]   ;;  %v723_v54 = vld [vmem:[#allocation2 + $0xd4] ss:$8 sps:$4 sm:$0xff]  }
  0x24   :  { %448 = vmatpush1.bf16.msra.mxu1 %v673_v18  ;;  %v719_v50 = vld [vmem:[#allocation2 + $0x1c4] ss:$8 sps:$4 sm:$0xff]   ;;  %v722_v53 = vld [vmem:[#allocation2 + $0x1c0] ss:$8 sps:$4 sm:$0xff]   ;;  %v725_v55 = vld [vmem:[#allocation2 + $0x1d4] ss:$8 sps:$4 sm:$0xff]  }
  0x25   :  { %491 = vmatpush1.bf16.msra.mxu0 %v674_v19  ;;  %449 = vmatprep.subr.bf16.mxu1 %v675_v20  ;;  %v727_v56 = vld [vmem:[#allocation2 + $0xd0] ss:$8 sps:$4 sm:$0xff]   ;;  %v729_v58 = vld [vmem:[#allocation2 + $0xe4] ss:$8 sps:$4 sm:$0xff]   ;;  %v733_v60 = vld [vmem:[#allocation2 + $0xe0] ss:$8 sps:$4 sm:$0xff]  }
  0x26   :  { %492 = vmatprep.subr.bf16.mxu0 %v677_v21  ;;  %v728_v57 = vld [vmem:[#allocation2 + $0x1d0] ss:$8 sps:$4 sm:$0xff]   ;;  %v731_v59 = vld [vmem:[#allocation2 + $0x1e4] ss:$8 sps:$4 sm:$0xff]   ;;  %v734_v61 = vld [vmem:[#allocation2 + $0x1e0] ss:$8 sps:$4 sm:$0xff]  }
  0x27   :  { %v735_v62 = vld [vmem:[#allocation2 + $0xf4] ss:$8 sps:$4 sm:$0xff]   ;;  %v739_v0 = vld [vmem:[#allocation2 + $0xf0] ss:$8 sps:$4 sm:$0xff]   ;;  %v528_v5 = vshrl.u32 %v527_v4, 7 }
  0x28   :  { %450 = vmatpush1.bf16.msra.mxu1 %v679_v22  ;;  %v737_v63 = vld [vmem:[#allocation2 + $0x1f4] ss:$8 sps:$4 sm:$0xff]   ;;  %v740_v1 = vld [vmem:[#allocation2 + $0x1f0] ss:$8 sps:$4 sm:$0xff]   ;;  %v525_v7 = vld [vmem:[%s843_s2] sm:$0x3] }
  0x29   :  { %493 = vmatpush1.bf16.msra.mxu0 %v680_v23  ;;  %451 = vmatprep.subr.bf16.mxu1 %v681_v24  ;;  %v741_v2 = vld [vmem:[%s841_s0] ss:$16 sps:$4 sm:$0xff]   ;;  %v744_v3 = vld [vmem:[%s841_s0 + $0x8] ss:$16 sps:$4 sm:$0xff]   ;;  %v529_v6 = vsub.s32 0, %v528_v5  ;;  %v533_v8 = vsub.s32 1, %v528_v5 }
  0x2a   :  { %494 = vmatprep.subr.bf16.mxu0 %v683_v25  ;;  %v541_v9 = vld [vmem:[%s844_s3] sm:$0x3] }
  0x2b   :  { %v530_v10 = vrot.slane %v525_v7, %v529_v6  ;;  %v534_v13 = vrot.slane %v525_v7, %v533_v8  ;;  %v546_v15 = vrot.slane %v541_v9, %v529_v6  ;;  %v550_v19 = vrot.slane %v541_v9, %v533_v8 }
  0x2c   :  { %452 = vmatpush1.bf16.msra.mxu1 %v685_v26 }
  0x2d   :  { %495 = vmatpush1.bf16.msra.mxu0 %v686_v27  ;;  %453 = vmatprep.subr.bf16.mxu1 %v687_v28 }
  0x2e   :  { %496 = vmatprep.subr.bf16.mxu0 %v689_v29 }
  0x30   :  { %454 = vmatpush1.bf16.msra.mxu1 %v691_v30 }
  0x31   :  { %497 = vmatpush1.bf16.msra.mxu0 %v692_v31  ;;  %455 = vmatprep.subr.bf16.mxu1 %v693_v32 }
  0x32   :  { %498 = vmatprep.subr.bf16.mxu0 %v695_v33 }
  0x34   :  { %456 = vmatpush1.bf16.msra.mxu1 %v697_v34 }
  0x35   :  { %499 = vmatpush1.bf16.msra.mxu0 %v698_v35  ;;  %457 = vmatprep.subr.bf16.mxu1 %v699_v36 }
  0x36   :  { %500 = vmatprep.subr.bf16.mxu0 %v701_v37 }
  0x38   :  { %458 = vmatpush1.bf16.msra.mxu1 %v703_v38 }
  0x39   :  { %501 = vmatpush1.bf16.msra.mxu0 %v704_v39  ;;  %459 = vmatprep.subr.bf16.mxu1 %v705_v40 }
  0x3a   :  { %502 = vmatprep.subr.bf16.mxu0 %v707_v41 }
  0x3c   :  { %460 = vmatpush1.bf16.msra.mxu1 %v709_v42 }
  0x3d   :  { %503 = vmatpush1.bf16.msra.mxu0 %v710_v43  ;;  %461 = vmatprep.subr.bf16.mxu1 %v711_v44 }
  0x3e   :  { %504 = vmatprep.subr.bf16.mxu0 %v713_v45 }
  0x40   :  { %462 = vmatpush1.bf16.msra.mxu1 %v715_v46 }
  0x41   :  { %505 = vmatpush1.bf16.msra.mxu0 %v716_v48  ;;  %463 = vmatprep.subr.bf16.mxu1 %v717_v49 }
  0x42   :  { %506 = vmatprep.subr.bf16.mxu0 %v719_v50 }
  0x44   :  { %464 = vmatpush1.bf16.msra.mxu1 %v721_v52 }
  0x45   :  { %507 = vmatpush1.bf16.msra.mxu0 %v722_v53  ;;  %465 = vmatprep.subr.bf16.mxu1 %v723_v54 }
  0x46   :  { %508 = vmatprep.subr.bf16.mxu0 %v725_v55 }
  0x48   :  { %466 = vmatpush1.bf16.msra.mxu1 %v727_v56 }
  0x49   :  { %509 = vmatpush1.bf16.msra.mxu0 %v728_v57  ;;  %467 = vmatprep.subr.bf16.mxu1 %v729_v58 }
  0x4a   :  { %510 = vmatprep.subr.bf16.mxu0 %v731_v59 }
  0x4c   :  { %468 = vmatpush1.bf16.msra.mxu1 %v733_v60 }
  0x4d   :  { %511 = vmatpush1.bf16.msra.mxu0 %v734_v61  ;;  %469 = vmatprep.subr.bf16.mxu1 %v735_v62 }
  0x4e   :  { %512 = vmatprep.subr.bf16.mxu0 %v737_v63 }
  0x50   :  { %470 = vmatpush1.bf16.msra.mxu1 %v739_v0 }
  0x51   :  { %513 = vmatpush1.bf16.msra.mxu0 %v740_v1 }
  0x53   :  { %472 = vmatmul.mubr.bf16.vlgmr.msra.gmra.mrb[0].mxu1 %v741_v2 }
  0x54   :  { %515 = vmatmul.mubr.bf16.vlgmr.msra.gmra.mrb[0].mxu0 %v744_v3 }
 0x126   :  { %v473_v11 = vpop.f32.mrb[0].mxu1 }
 0x127   :  { %v516_v12 = vpop.f32.mrb[0].mxu0  ;;  %v475_v16 = vpop.f32.mrb[1].mxu1 }
 0x128   :  { %v517_v14 = vadd.f32 %v516_v12, %v473_v11  ;;  %v518_v17 = vpop.f32.mrb[1].mxu0  ;;  %v477_v20 = vpop.f32.mrb[2].mxu1 }
 0x129   :  { %v519_v18 = vadd.f32 %v518_v17, %v475_v16  ;;  %v520_v21 = vpop.f32.mrb[2].mxu0  ;;  %v479_v24 = vpop.f32.mrb[3].mxu1 }
 0x12a   :  { %v537_v22 = vmul.f32 %v530_v10, %v517_v14  ;;  %v521_v23 = vadd.f32 %v520_v21, %v477_v20  ;;  %v522_v25 = vpop.f32.mrb[3].mxu0 }
 0x12b   :  { %v538_v26 = vmul.f32 %v534_v13, %v519_v18  ;;  %v523_v27 = vadd.f32 %v522_v25, %v479_v24 }
 0x12c   :  { %v553_v28 = vadd.f32 %v546_v15, %v537_v22  ;;  %v539_v29 = vmul.f32 %v530_v10, %v521_v23 }
 0x12d   :  { %v554_v30 = vadd.f32 %v550_v19, %v538_v26  ;;  %v540_v31 = vmul.f32 %v534_v13, %v523_v27 }
 0x12e   :  { %v557_v32 = vmax.f32 %v553_v28, 0.0  ;;  %v555_v33 = vadd.f32 %v546_v15, %v539_v29 }
 0x12f   :  { %v558_v34 = vmax.f32 %v554_v30, 0.0  ;;  %v556_v35 = vadd.f32 %v550_v19, %v540_v31 }
 0x130   :  { %561 = vst [vmem:[%s845_s4] sm:$0xff] %v557_v32  ;;  %v559_v36 = vmax.f32 %v555_v33, 0.0 }
 0x131   :  { %562 = vst [vmem:[%s845_s4 + $0x8] sm:$0xff] %v558_v34  ;;  %v560_v37 = vmax.f32 %v556_v35, 0.0 }
 0x132   :  { %563 = vst [vmem:[%s845_s4 + $0x10] sm:$0xff] %v559_v36 }
 0x133   :  { %564 = vst [vmem:[%s845_s4 + $0x18] sm:$0xff] %v560_v37 }
 0x134   :  { %569 = vsyncpa [#allocation3], 1 }

</bundles_post_ra>
